<compile_context>
chip_gen: v5e
topology: v5e:2x2
jax: 0.10.0
libtpu: 0.0.40
codegen_flags: <defaults>
</compile_context>

<pallas_src>
import jax
import jax.numpy as jnp
from jax.experimental import pallas as pl
from jax.experimental.pallas import tpu as pltpu

NEG_BIG = -1e30  # finite "minus infinity": exp(NEG_BIG - finite) underflows to 0,
                 # and NEG_BIG - NEG_BIG == 0 exactly, so no NaN can ever appear.


def _round_up(x, m):
    return ((x + m - 1) // m) * m


# ---------------------------------------------------------------------------
# Kernels
# ---------------------------------------------------------------------------
def encoder_kernel(x_ref, w1_ref, b1_ref, w2_ref, b2_ref, w3_ref, b3_ref,
                   g_ref, acc_ref):
    """g = tanh(tanh(tanh(X@W1+b1) @ W2 + b2) @ W3 + b3); X@W1 reduced over M tiles."""
    m = pl.program_id(1)

    @pl.when(m == 0)
    def _():
        acc_ref[...] = jnp.zeros(acc_ref.shape, acc_ref.dtype)

    # bf16 MXU matmul, f32 accumulation.
    acc_ref[...] += jnp.dot(x_ref[...], w1_ref[...],
                            preferred_element_type=jnp.float32)

    @pl.when(m == pl.num_programs(1) - 1)
    def _():
        h1 = jnp.tanh(acc_ref[...] + b1_ref[...])                        # (TB, Hp) f32
        h2 = jnp.tanh(jnp.dot(h1.astype(jnp.bfloat16), w2_ref[...],
                              preferred_element_type=jnp.float32) + b2_ref[...])
        g = jnp.tanh(jnp.dot(h2.astype(jnp.bfloat16), w3_ref[...],
                             preferred_element_type=jnp.float32) + b3_ref[...])
        g_ref[...] = g.astype(g_ref.dtype)                               # (TB, Hp) bf16


def decoder_kernel(g_ref, w4_ref, b4_ref, logits_ref, lse_ref, cmax_ref, csum_ref):
    """logits tile = g @ W4_tile + b4_tile; lane-parallel online logsumexp.

    cmax/csum hold, per (row, lane mod 128), the running max / running sum of
    exp over all columns seen so far.  The hot loop uses only VPU max/add and
    EUP exp (no cross-lane XLU work); the two XLU reduces happen once per
    batch tile in the finalize.
    """
    m = pl.program_id(1)

    @pl.when(m == 0)
    def _():
        cmax_ref[...] = jnp.full(cmax_ref.shape, NEG_BIG, cmax_ref.dtype)
        csum_ref[...] = jnp.zeros(csum_ref.shape, csum_ref.dtype)

    logits = jnp.dot(g_ref[...], w4_ref[...],
                     preferred_element_type=jnp.float32) + b4_ref[...]
    logits_ref[...] = logits                                             # lane-dense store

    C = 128
    n_chunks = logits.shape[-1] // C

    # Per-lane tile max via VPU folds over 128-lane chunks (no XLU).
    m_lane = logits[:, 0:C]
    for c in range(1, n_chunks):
        m_lane = jnp.maximum(m_lane, logits[:, c * C:(c + 1) * C])
    new_cmax = jnp.maximum(cmax_ref[...], m_lane)

    # Rescale old per-lane sums, then add the exp of each lane chunk.
    s = csum_ref[...] * jnp.exp(cmax_ref[...] - new_cmax)
    for c in range(n_chunks):
        s = s + jnp.exp(logits[:, c * C:(c + 1) * C] - new_cmax)
    csum_ref[...] = s
    cmax_ref[...] = new_cmax

    @pl.when(m == pl.num_programs(1) - 1)
    def _():
        # Only cross-lane reduces of the whole decode: (TB,128) -> (TB,1).
        gmax = jnp.max(cmax_ref[...], axis=-1, keepdims=True)
        tot = jnp.sum(csum_ref[...] * jnp.exp(cmax_ref[...] - gmax),
                      axis=-1, keepdims=True)
        lse_ref[...] = gmax + jnp.log(tot)


def normalize_kernel(logits_ref, lse_ref, out_ref):
    """log_softmax epilogue: logits - logsumexp (big lane-dense tiles)."""
    out_ref[...] = logits_ref[...] - lse_ref[...]


# ---------------------------------------------------------------------------
# Tile / VMEM sizing helpers
# ---------------------------------------------------------------------------
def _default_vmem_limit_bytes():
    limit = 48 * 1024 * 1024                    # safe on every generation (v7x: 64 MiB/TC)
    try:
        cap = pltpu.get_tpu_info().vmem_capacity_bytes
        limit = int(min(96 * 1024 * 1024, cap * 3 // 4))
    except Exception:
        pass
    return limit


def _encoder_bytes(tb, tm, Hp, Dp):
    return (2 * tb * tm * 2            # X tile bf16, double buffered
            + 2 * tm * Hp * 2          # W1 tile bf16, double buffered
            + 2 * (Hp * Dp + Dp * Hp) * 2   # W2 / W3 resident (2 bufs each)
            + 2 * tb * Hp * 2          # g output
            + tb * Hp * 4              # acc scratch f32
            + 8 * Hp * 4 + 4 * Dp * 4)  # biases


def _decoder_bytes(tb, tm, Hp):
    return (2 * tb * tm * 4            # logits out f32, double buffered
            + 2 * Hp * tm * 2          # W4 tile bf16, double buffered
            + 2 * tb * Hp * 2          # g input
            + 2 * tb * 128 * 4         # cmax + csum scratch
            + 4 * tm * 4 + 4 * tb * 4)  # b4 tile + lse out


def _normalize_bytes(tb, tm):
    return 4 * tb * tm * 4 + 4 * tb * 4


def _choose_tm(M):
    # Large lane-dense item tile; small catalogs get a single tile.
    return min(2048, _round_up(M, 128))


def _choose_tb(B, tm, Hp, Dp, budget_bytes):
    # Largest batch tile (<=1024, multiple of 8) that fits the VMEM budget;
    # a bigger TB means W1/W4 are streamed from HBM fewer times per forward.
    tb = _round_up(min(B, 1024), 8)
    while tb > 8 and max(_encoder_bytes(tb, tm, Hp, Dp),
                         _decoder_bytes(tb, tm, Hp),
                         _normalize_bytes(tb, tm)) > budget_bytes:
        tb = max(8, _round_up(tb // 2, 8))
    return tb


# ---------------------------------------------------------------------------
# Parameter preparation (hoisted out of the per-call path)
# ---------------------------------------------------------------------------
def prepare_params(params, *, tm=None):
    """Pad + cast the weights ONCE at model load time."""
    w1, b1, w2, b2, w3, b3, w4, b4 = params
    M, H = w1.shape
    D = w2.shape[1]
    if tm is None:
        tm = _choose_tm(M)
    Mp = _round_up(M, tm)
    Hp = _round_up(H, 128)
    Dp = _round_up(D, 128)

    def pad2(a, shape, value=0.0):
        return jnp.pad(a, [(0, s - d) for d, s in zip(a.shape, shape)],
                       constant_values=value)

    bf = jnp.bfloat16
    return {
        "tm": tm, "M": M, "H": H, "D": D, "Mp": Mp, "Hp": Hp, "Dp": Dp,
        "w1": pad2(w1, (Mp, Hp)).astype(bf),
        "w2": pad2(w2, (Hp, Dp)).astype(bf),
        "w3": pad2(w3, (Dp, Hp)).astype(bf),
        "w4": pad2(w4, (Hp, Mp)).astype(bf),
        "b1": pad2(b1, (1, Hp)).astype(jnp.float32),
        "b2": pad2(b2, (1, Dp)).astype(jnp.float32),
        "b3": pad2(b3, (1, Hp)).astype(jnp.float32),
        # Padded item columns get a huge (finite) negative bias: their exp
        # underflows to 0 in the logsumexp and they never win the row max.
        "b4": pad2(b4, (1, Mp), value=NEG_BIG).astype(jnp.float32),
    }


# ---------------------------------------------------------------------------
# Forward wrapper
# ---------------------------------------------------------------------------
def multidae_forward(X, prepared, A=None, *, tb=None, vmem_limit_bytes=None):
    """MultiDAE forward: encode -> decode -> log_softmax(dim=1)."""
    del A  # unused by the reference forward
    B, M = X.shape
    assert M == prepared["M"], "item dimension mismatch with prepared params"
    TM, Mp, Hp, Dp = prepared["tm"], prepared["Mp"], prepared["Hp"], prepared["Dp"]

    if vmem_limit_bytes is None:
        vmem_limit_bytes = _default_vmem_limit_bytes()
    if tb is None:
        tb = _choose_tb(B, TM, Hp, Dp, int(vmem_limit_bytes * 0.8))
    TB = tb
    Bp = _round_up(B, TB)
    nb, nm = Bp // TB, Mp // TM

    Xp = jnp.pad(X, ((0, Bp - B), (0, Mp - M))).astype(jnp.bfloat16)  # 0/1 exact in bf16

    def cparams(sem):
        return pltpu.CompilerParams(dimension_semantics=sem,
                                    vmem_limit_bytes=vmem_limit_bytes)

    # ---- encoder: X -> g (bottleneck + first decoder layer fused) ----------
    g = pl.pallas_call(
        encoder_kernel,
        out_shape=jax.ShapeDtypeStruct((Bp, Hp), jnp.bfloat16),
        grid_spec=pltpu.PrefetchScalarGridSpec(
            num_scalar_prefetch=0,
            grid=(nb, nm),
            in_specs=[
                pl.BlockSpec((TB, TM), lambda b, m: (b, m)),   # X tile (streamed)
                pl.BlockSpec((TM, Hp), lambda b, m: (m, 0)),   # W1 tile (streamed)
                pl.BlockSpec((1, Hp), lambda b, m: (0, 0)),    # b1 (resident)
                pl.BlockSpec((Hp, Dp), lambda b, m: (0, 0)),   # W2 (resident)
                pl.BlockSpec((1, Dp), lambda b, m: (0, 0)),    # b2 (resident)
                pl.BlockSpec((Dp, Hp), lambda b, m: (0, 0)),   # W3 (resident)
                pl.BlockSpec((1, Hp), lambda b, m: (0, 0)),    # b3 (resident)
            ],
            out_specs=pl.BlockSpec((TB, Hp), lambda b, m: (b, 0)),
            scratch_shapes=[pltpu.VMEM((TB, Hp), jnp.float32)],
        ),
        compiler_params=cparams(("parallel", "arbitrary")),
    )(Xp, prepared["w1"], prepared["b1"], prepared["w2"], prepared["b2"],
      prepared["w3"], prepared["b3"])

    # ---- decoder: logits + lane-parallel online logsumexp ------------------
    logits_p, lse = pl.pallas_call(
        decoder_kernel,
        out_shape=(jax.ShapeDtypeStruct((Bp, Mp), jnp.float32),
                   jax.ShapeDtypeStruct((Bp, 1), jnp.float32)),
        grid_spec=pltpu.PrefetchScalarGridSpec(
            num_scalar_prefetch=0,
            grid=(nb, nm),
            in_specs=[
                pl.BlockSpec((TB, Hp), lambda b, m: (b, 0)),   # g (resident per b)
                pl.BlockSpec((Hp, TM), lambda b, m: (0, m)),   # W4 tile (streamed)
                pl.BlockSpec((1, TM), lambda b, m: (0, m)),    # b4 tile
            ],
            out_specs=[
                pl.BlockSpec((TB, TM), lambda b, m: (b, m)),   # logits (lane-dense)
                pl.BlockSpec((TB, 1), lambda b, m: (b, 0)),    # logsumexp
            ],
            scratch_shapes=[pltpu.VMEM((TB, 128), jnp.float32),   # per-lane running max
                            pltpu.VMEM((TB, 128), jnp.float32)],  # per-lane running sum-exp
        ),
        compiler_params=cparams(("parallel", "arbitrary")),
    )(g, prepared["w4"], prepared["b4"])

    # ---- log_softmax epilogue (same big lane-dense tiles) -------------------
    log_probs_p = pl.pallas_call(
        normalize_kernel,
        out_shape=jax.ShapeDtypeStruct((Bp, Mp), jnp.float32),
        grid_spec=pltpu.PrefetchScalarGridSpec(
            num_scalar_prefetch=0,
            grid=(nb, nm),
            in_specs=[
                pl.BlockSpec((TB, TM), lambda b, m: (b, m)),
                pl.BlockSpec((TB, 1), lambda b, m: (b, 0)),
            ],
            out_specs=pl.BlockSpec((TB, TM), lambda b, m: (b, m)),
        ),
        compiler_params=cparams(("parallel", "parallel")),
    )(logits_p, lse)

    log_probs = log_probs_p[:B, :M]
    # matches MultiDAE.forward return signature
    return (log_probs, None, None, None, None, None)


# ---------------------------------------------------------------------------
# Params / reference / loss
# ---------------------------------------------------------------------------
def init_params(key, M, D):
    """PyTorch nn.Linear-style init; weights stored transposed as (in, out)."""
    H = 3 * D
    ks = jax.random.split(key, 8)

    def lin(kw, kb, fan_in, fan_out):
        bound = 1.0 / jnp.sqrt(jnp.float32(fan_in))
        w = jax.random.uniform(kw, (fan_in, fan_out), jnp.float32, -bound, bound)
        b = jax.random.uniform(kb, (1, fan_out), jnp.float32, -bound, bound)
        return w, b

    w1, b1 = lin(ks[0], ks[1], M, H)   # encoder Linear(M, H)
    w2, b2 = lin(ks[2], ks[3], H, D)   # encoder Linear(H, D)
    w3, b3 = lin(ks[4], ks[5], D, H)   # decoder Linear(D, H)
    w4, b4 = lin(ks[6], ks[7], H, M)   # decoder Linear(H, M)
    return (w1, b1, w2, b2, w3, b3, w4, b4)


def multidae_reference(X, params):
    """Pure-JAX f32 reference of the PyTorch forward (eval mode)."""
    w1, b1, w2, b2, w3, b3, w4, b4 = params
    h = jnp.tanh(X @ w1 + b1)
    h = jnp.tanh(h @ w2 + b2)
    g = jnp.tanh(h @ w3 + b3)
    logits = g @ w4 + b4
    return jax.nn.log_softmax(logits, axis=1)


def recon_loss(inputs, logits):
    # torch.mean(torch.sum(-logits * inputs, dim=1))
    return jnp.mean(jnp.sum(-logits * inputs, axis=1))


# ---------------------------------------------------------------------------
if __name__ == "__main__":
    # Small test shapes (real MultiDAE: M ~ 10k-50k items, D ~ 200, B >= 256).
    B, M, D = 16, 300, 32          # H = 96; padded to Hp = Dp = 128, Mp = 384
    key = jax.random.PRNGKey(0)
    kx, kp = jax.random.split(key)

    # binary implicit-feedback style input, as MultiDAE expects
    X = (jax.random.uniform(kx, (B, M)) > 0.7).astype(jnp.float32)
    A = None  # unused in forward

    params = init_params(kp, M, D)
    prepared = prepare_params(params)          # pad/cast once at "model load"

    logits, *_ = multidae_forward(X, prepared, A)
    logits = jax.block_until_ready(logits)

    assert logits.shape == (B, M)
    # log_softmax rows must sum to 1 in probability space
    row_sums = jnp.sum(jnp.exp(logits), axis=1)
    assert jnp.allclose(row_sums, jnp.ones((B,)), atol=1e-3)

    # compare against pure-JAX f32 reference (bf16 MXU inputs -> loose tolerance)
    ref = multidae_reference(X, params)
    assert float(jnp.max(jnp.abs(logits - ref))) < 0.1

    _ = jax.block_until_ready(recon_loss(X, logits))
    print("KERNEL_OK")
</pallas_src>

<mosaic_0001>
module attributes {stable_mosaic.version = 11 : i64} {
  func.func @encoder_kernel(%arg0: i32, %arg1: i32, %arg2: memref<16x384xbf16, #tpu.memory_space<vmem>>, %arg3: memref<384x128xbf16, #tpu.memory_space<vmem>>, %arg4: memref<1x128xf32, #tpu.memory_space<vmem>>, %arg5: memref<128x128xbf16, #tpu.memory_space<vmem>>, %arg6: memref<1x128xf32, #tpu.memory_space<vmem>>, %arg7: memref<128x128xbf16, #tpu.memory_space<vmem>>, %arg8: memref<1x128xf32, #tpu.memory_space<vmem>>, %arg9: memref<16x128xbf16, #tpu.memory_space<vmem>>, %arg10: memref<16x128xf32, #tpu.memory_space<vmem>>) attributes {dimension_semantics = [#tpu.dimension_semantics<parallel>, #tpu.dimension_semantics<arbitrary>], iteration_bounds = array<i64: 1, 1>, scalar_prefetch = 0 : i64, scratch_operands = 1 : i64, tpu.core_type = #tpu.core_type<tc>, window_params = [{transform_indices = @transform_0, window_bounds = array<i64: 16, 384>}, {transform_indices = @transform_1, window_bounds = array<i64: 384, 128>}, {pipeline_mode = #tpu.pipeline_mode<synchronous>, transform_indices = @transform_2, window_bounds = array<i64: 1, 128>}, {pipeline_mode = #tpu.pipeline_mode<synchronous>, transform_indices = @transform_3, window_bounds = array<i64: 128, 128>}, {pipeline_mode = #tpu.pipeline_mode<synchronous>, transform_indices = @transform_4, window_bounds = array<i64: 1, 128>}, {pipeline_mode = #tpu.pipeline_mode<synchronous>, transform_indices = @transform_5, window_bounds = array<i64: 128, 128>}, {pipeline_mode = #tpu.pipeline_mode<synchronous>, transform_indices = @transform_6, window_bounds = array<i64: 1, 128>}, {transform_indices = @transform_7, window_bounds = array<i64: 16, 128>}]} {
    %c0_i32 = arith.constant 0 : i32
    %0 = arith.cmpi eq, %arg1, %c0_i32 : i32
    %1 = arith.extui %0 : i1 to i32
    %c0_i32_0 = arith.constant 0 : i32
    %2 = arith.cmpi ne, %1, %c0_i32_0 : i32
    scf.if %2 {
      %cst_10 = arith.constant 0.000000e+00 : f32
      %12 = vector.broadcast %cst_10 : f32 to vector<16x128xf32>
      %c0_11 = arith.constant 0 : index
      %c0_12 = arith.constant 0 : index
      %13 = vector.load %arg10[%c0_11, %c0_12] : memref<16x128xf32, #tpu.memory_space<vmem>>, vector<16x128xf32>
      tpu.vector_store %arg10[%c0_11, %c0_12], %12 {strides = array<i32>} : memref<16x128xf32, #tpu.memory_space<vmem>>, vector<16x128xf32>,
    } else {
    }
    %c0 = arith.constant 0 : index
    %c0_1 = arith.constant 0 : index
    %3 = vector.load %arg10[%c0, %c0_1] : memref<16x128xf32, #tpu.memory_space<vmem>>, vector<16x128xf32>
    %c0_2 = arith.constant 0 : index
    %c0_3 = arith.constant 0 : index
    %4 = vector.load %arg2[%c0_2, %c0_3] : memref<16x384xbf16, #tpu.memory_space<vmem>>, vector<16x384xbf16>
    %c0_4 = arith.constant 0 : index
    %c0_5 = arith.constant 0 : index
    %5 = vector.load %arg3[%c0_4, %c0_5] : memref<384x128xbf16, #tpu.memory_space<vmem>>, vector<384x128xbf16>
    %cst = arith.constant dense<0.000000e+00> : vector<16x128xf32>
    %6 = tpu.matmul %4, %5, %cst {dimension_numbers = #tpu.dot_dimension_numbers<[1], [0], [0], [1], [0, 0, 1, 1], [], []>} : vector<16x384xbf16>, vector<384x128xbf16>, vector<16x128xf32> -> vector<16x128xf32>
    %7 = arith.addf %3, %6 : vector<16x128xf32>
    %c0_6 = arith.constant 0 : index
    %c0_7 = arith.constant 0 : index
    %8 = vector.load %arg10[%c0_6, %c0_7] : memref<16x128xf32, #tpu.memory_space<vmem>>, vector<16x128xf32>
    tpu.vector_store %arg10[%c0_6, %c0_7], %7 {strides = array<i32>} : memref<16x128xf32, #tpu.memory_space<vmem>>, vector<16x128xf32>,
    %c0_i32_8 = arith.constant 0 : i32
    %9 = arith.cmpi eq, %arg1, %c0_i32_8 : i32
    %10 = arith.extui %9 : i1 to i32
    %c0_i32_9 = arith.constant 0 : i32
    %11 = arith.cmpi ne, %10, %c0_i32_9 : i32
    scf.if %11 {
      %c0_10 = arith.constant 0 : index
      %c0_11 = arith.constant 0 : index
      %12 = vector.load %arg10[%c0_10, %c0_11] : memref<16x128xf32, #tpu.memory_space<vmem>>, vector<16x128xf32>
      %c0_12 = arith.constant 0 : index
      %c0_13 = arith.constant 0 : index
      %13 = vector.load %arg4[%c0_12, %c0_13] : memref<1x128xf32, #tpu.memory_space<vmem>>, vector<1x128xf32>
      %14 = vector.broadcast %13 : vector<1x128xf32> to vector<16x128xf32>
      %15 = arith.addf %12, %14 : vector<16x128xf32>
      %16 = math.tanh %15 : vector<16x128xf32>
      %17 = arith.truncf %16 : vector<16x128xf32> to vector<16x128xbf16>
      %c0_14 = arith.constant 0 : index
      %c0_15 = arith.constant 0 : index
      %18 = vector.load %arg5[%c0_14, %c0_15] : memref<128x128xbf16, #tpu.memory_space<vmem>>, vector<128x128xbf16>
      %cst_16 = arith.constant dense<0.000000e+00> : vector<16x128xf32>
      %19 = tpu.matmul %17, %18, %cst_16 {dimension_numbers = #tpu.dot_dimension_numbers<[1], [0], [0], [1], [0, 0, 1, 1], [], []>} : vector<16x128xbf16>, vector<128x128xbf16>, vector<16x128xf32> -> vector<16x128xf32>
      %c0_17 = arith.constant 0 : index
      %c0_18 = arith.constant 0 : index
      %20 = vector.load %arg6[%c0_17, %c0_18] : memref<1x128xf32, #tpu.memory_space<vmem>>, vector<1x128xf32>
      %21 = vector.broadcast %20 : vector<1x128xf32> to vector<16x128xf32>
      %22 = arith.addf %19, %21 : vector<16x128xf32>
      %23 = math.tanh %22 : vector<16x128xf32>
      %24 = arith.truncf %23 : vector<16x128xf32> to vector<16x128xbf16>
      %c0_19 = arith.constant 0 : index
      %c0_20 = arith.constant 0 : index
      %25 = vector.load %arg7[%c0_19, %c0_20] : memref<128x128xbf16, #tpu.memory_space<vmem>>, vector<128x128xbf16>
      %cst_21 = arith.constant dense<0.000000e+00> : vector<16x128xf32>
      %26 = tpu.matmul %24, %25, %cst_21 {dimension_numbers = #tpu.dot_dimension_numbers<[1], [0], [0], [1], [0, 0, 1, 1], [], []>} : vector<16x128xbf16>, vector<128x128xbf16>, vector<16x128xf32> -> vector<16x128xf32>
      %c0_22 = arith.constant 0 : index
      %c0_23 = arith.constant 0 : index
      %27 = vector.load %arg8[%c0_22, %c0_23] : memref<1x128xf32, #tpu.memory_space<vmem>>, vector<1x128xf32>
      %28 = vector.broadcast %27 : vector<1x128xf32> to vector<16x128xf32>
      %29 = arith.addf %26, %28 : vector<16x128xf32>
      %30 = math.tanh %29 : vector<16x128xf32>
      %31 = arith.truncf %30 : vector<16x128xf32> to vector<16x128xbf16>
      %c0_24 = arith.constant 0 : index
      %c0_25 = arith.constant 0 : index
      %32 = vector.load %arg9[%c0_24, %c0_25] : memref<16x128xbf16, #tpu.memory_space<vmem>>, vector<16x128xbf16>
      tpu.vector_store %arg9[%c0_24, %c0_25], %31 {strides = array<i32>} : memref<16x128xbf16, #tpu.memory_space<vmem>>, vector<16x128xbf16>,
    } else {
    }
    return
  }
  func.func @transform_0(%arg0: i32, %arg1: i32) -> (i32, i32) {
    %c0_i32 = arith.constant 0 : i32
    return %arg0, %arg1 : i32, i32
  }
  func.func @transform_1(%arg0: i32, %arg1: i32) -> (i32, i32) {
    %c0_i32 = arith.constant 0 : i32
    %c0_i32_0 = arith.constant 0 : i32
    return %arg1, %c0_i32 : i32, i32
  }
  func.func @transform_2(%arg0: i32, %arg1: i32) -> (i32, i32) {
    %c0_i32 = arith.constant 0 : i32
    %c0_i32_0 = arith.constant 0 : i32
    %c0_i32_1 = arith.constant 0 : i32
    return %c0_i32, %c0_i32_0 : i32, i32
  }
  func.func @transform_3(%arg0: i32, %arg1: i32) -> (i32, i32) {
    %c0_i32 = arith.constant 0 : i32
    %c0_i32_0 = arith.constant 0 : i32
    %c0_i32_1 = arith.constant 0 : i32
    return %c0_i32, %c0_i32_0 : i32, i32
  }
  func.func @transform_4(%arg0: i32, %arg1: i32) -> (i32, i32) {
    %c0_i32 = arith.constant 0 : i32
    %c0_i32_0 = arith.constant 0 : i32
    %c0_i32_1 = arith.constant 0 : i32
    return %c0_i32, %c0_i32_0 : i32, i32
  }
  func.func @transform_5(%arg0: i32, %arg1: i32) -> (i32, i32) {
    %c0_i32 = arith.constant 0 : i32
    %c0_i32_0 = arith.constant 0 : i32
    %c0_i32_1 = arith.constant 0 : i32
    return %c0_i32, %c0_i32_0 : i32, i32
  }
  func.func @transform_6(%arg0: i32, %arg1: i32) -> (i32, i32) {
    %c0_i32 = arith.constant 0 : i32
    %c0_i32_0 = arith.constant 0 : i32
    %c0_i32_1 = arith.constant 0 : i32
    return %c0_i32, %c0_i32_0 : i32, i32
  }
  func.func @transform_7(%arg0: i32, %arg1: i32) -> (i32, i32) {
    %c0_i32 = arith.constant 0 : i32
    %c0_i32_0 = arith.constant 0 : i32
    return %arg0, %c0_i32 : i32, i32
  }
}

</mosaic_0001>

<bundles_post_ra>
// kernel: tpu_custom_call.1
= control target key start
LH: loop header
LB: loop body
LE: loop exit
PB: predicated region body
PF: predicated region fallthrough
CT: control target
= control target key end

     0   :  { %12 = vsyncpa [#allocation4], 0  ;;  %s1021_s0 = inlined_call_operand.hbm [shape: bf16[16,384], index: 0, kind: input, shape index: {}]   ;;  %s1022_s1 = inlined_call_operand.hbm [shape: bf16[384,128], index: 1, kind: input, shape index: {}]   ;;  %s1023_s2 = inlined_call_operand.vmem [shape: f32[1,128], index: 2, kind: input, shape index: {}]   ;;  %s1024_s3 = inlined_call_operand.hbm [shape: bf16[128,128], index: 3, kind: input, shape index: {}]   ;;  %s1025_s4 = inlined_call_operand.vmem [shape: f32[1,128], index: 4, kind: input, shape index: {}]   ;;  %s1026_s5 = inlined_call_operand.hbm [shape: bf16[128,128], index: 5, kind: input, shape index: {}]   ;;  %s1027_s6 = inlined_call_operand.vmem [shape: f32[1,128], index: 6, kind: input, shape index: {}]   ;;  %s1028_s7 = inlined_call_operand.hbm [shape: bf16[16,128], index: 7, kind: output, shape index: {}]  }
   0x1   :  { %13 = vsyncpa [#allocation7], 0 }
   0x2   :  { %14 = vsyncpa [#allocation10], 0  ;;  %s33_s26 = sshll.u32 %s1022_s1, 4  ;;  %s34_s26 = int_to_ptr.hbm [resolvable:$true] %s33_s26 }
   0x3   :  { %15 = vsyncpa [#allocation5], 0  ;;  %s936_s27 = smov [#allocation6]   ;;  %s20_s8 = sshll.u32 %s1021_s0, 4  ;;  %s21_s8 = int_to_ptr.hbm [resolvable:$true] %s20_s8 }
   0x4   :  { %s35_s28 = sshll.u32 %s936_s27, 4  ;;  %s937_s9 = smov 64   ;;  %s36_s28 = int_to_ptr.vmem [resolvable:$true] %s35_s28 }
   0x5   :  { %s938_s10 = smov 4   ;;  %s939_s11 = smov [#allocation3]  }
   0x6   :  { %41 = dma.hbm_to_vmem [thread:$0]  %s34_s26, 3072, %s36_s28, [#allocation7], %s937_s9, %s937_s9, %s938_s10  }
   0x7   :  { %s22_s12 = sshll.u32 %s939_s11, 4  ;;  %s940_s1 = smov 192   ;;  %s23_s12 = int_to_ptr.vmem [resolvable:$true] %s22_s12 }
   0x8   :  { %s941_s13 = smov 12   ;;  %s48_s16 = sshll.u32 %s1024_s3, 4  ;;  %s49_s16 = int_to_ptr.hbm [resolvable:$true] %s48_s16 }
   0x9   :  { %28 = dma.hbm_to_vmem [thread:$0]  %s21_s8, 384, %s23_s12, [#allocation4], %s940_s1, %s940_s1, %s941_s13  }
   0xa   :  { %s942_s17 = smov [#allocation8]   ;;  %s63_s20 = sshll.u32 %s1026_s5, 4  ;;  %s64_s20 = int_to_ptr.hbm [resolvable:$true] %s63_s20 }
   0xb   :  { %s50_s0 = sshll.u32 %s942_s17, 4  ;;  %s943_s21 = smov [#allocation9]   ;;  %s51_s0 = int_to_ptr.vmem [resolvable:$true] %s50_s0 }
   0xc   :  { %56 = dma.hbm_to_vmem [thread:$0]  %s49_s16, 1024, %s51_s0, [#allocation7], %s937_s9, %s937_s9, %s938_s10  }
   0xd   :  { %s65_s22 = sshll.u32 %s943_s21, 4  ;;  %s66_s22 = int_to_ptr.vmem [resolvable:$true] %s65_s22 }
   0xe   :  { %71 = dma.hbm_to_vmem [thread:$0]  %s64_s20, 1024, %s66_s22, [#allocation10], %s937_s9, %s937_s9, %s938_s10  }
   0xf   :  { %928 = dma.done.wait [#allocation4], 384  }
  0x10   :  { %929 = vsyncadd [#allocation4], 4294966912 }
  0x11   :  { %930 = dma.done.wait [#allocation7], 4096  }
  0x12   :  { %931 = vsyncadd [#allocation7], 4294963200 }
  0x13   :  { %932 = dma.done.wait [#allocation10], 1024  }
  0x14   :  { %933 = vsyncadd [#allocation10], 4294966272  ;;  %v746_v0 = vld [vmem:[#allocation6 + $0x38] sm:$0xff]  ;;  %v745_v3 = vld [vmem:[#allocation6 + $0x30] sm:$0xff]  ;;  %s549_s29 = sshll.u32 %s1028_s7, 4  ;;  %s550_s29 = int_to_ptr.hbm [resolvable:$true] %s549_s29 }
  0x15   :  { %v754_v1 = vld [vmem:[#allocation6 + $0x78] sm:$0xff]  ;;  %310 = vmatpush.bf16.msra.mxu0 %v746_v0  ;;  %v753_v4 = vld [vmem:[#allocation6 + $0x70] sm:$0xff]  ;;  %v744_v6 = vld [vmem:[#allocation6 + $0x28] sm:$0xff] }
  0x16   :  { %v762_v2 = vld [vmem:[#allocation6 + $0xb8] sm:$0xff]  ;;  %324 = vmatpush.bf16.msra.mxu1 %v754_v1  ;;  %v761_v5 = vld [vmem:[#allocation6 + $0xb0] sm:$0xff]  ;;  %v752_v7 = vld [vmem:[#allocation6 + $0x68] sm:$0xff] }
  0x17   :  { %338 = vmatpush.bf16.msra.mxu2 %v762_v2  ;;  %v760_v8 = vld [vmem:[#allocation6 + $0xa8] sm:$0xff]  ;;  %v743_v9 = vld [vmem:[#allocation6 + $0x20] sm:$0xff]  ;;  %v770_v11 = vld [vmem:[#allocation8 + $0x38] sm:$0xff] }
  0x18   :  { %v751_v10 = vld [vmem:[#allocation6 + $0x60] sm:$0xff]  ;;  %438 = vmatpush.bf16.msra.mxu3 %v770_v11  ;;  %v742_v13 = vld [vmem:[#allocation6 + $0x18] sm:$0xff]  ;;  %v741_v16 = vld [vmem:[#allocation6 + $0x10] sm:$0xff] }
  0x19   :  { %311 = vmatpush.bf16.msra.mxu0 %v745_v3  ;;  %v759_v12 = vld [vmem:[#allocation6 + $0xa0] sm:$0xff]  ;;  %v750_v14 = vld [vmem:[#allocation6 + $0x58] sm:$0xff]  ;;  %v749_v17 = vld [vmem:[#allocation6 + $0x50] sm:$0xff] }
  0x1a   :  { %325 = vmatpush.bf16.msra.mxu1 %v753_v4  ;;  %v758_v15 = vld [vmem:[#allocation6 + $0x98] sm:$0xff]  ;;  %v757_v18 = vld [vmem:[#allocation6 + $0x90] sm:$0xff]  ;;  %v740_v19 = vld [vmem:[#allocation6 + $0x8] sm:$0xff] }
  0x1b   :  { %339 = vmatpush.bf16.msra.mxu2 %v761_v5  ;;  %v748_v20 = vld [vmem:[#allocation6 + $0x48] sm:$0xff]  ;;  %v739_v22 = vld [vmem:[#allocation6] sm:$0xff]  ;;  %v737_v25 = vld [vmem:[#allocation3 + $0x8] sm:$0xf0] }
  0x1c   :  { %v756_v21 = vld [vmem:[#allocation6 + $0x88] sm:$0xff]  ;;  %v747_v23 = vld [vmem:[#allocation6 + $0x40] sm:$0xff]  ;;  %v568_v27 = vld [vmem:[#allocation3 + $0xc] sm:$0xf0] }
  0x1d   :  { %312 = vmatpush.bf16.msra.mxu0 %v744_v6  ;;  %v566_v24 = vld [vmem:[#allocation3] sm:$0xf]  ;;  %v736_v26 = vld [vmem:[#allocation3 + $0x4] sm:$0xf]  ;;  %v755_v28 = vld [vmem:[#allocation6 + $0x80] sm:$0xff] }
  0x1e   :  { %326 = vmatpush.bf16.msra.mxu1 %v752_v7  ;;  %v574_v29 = vld [vmem:[#allocation3 + $0x8] sm:$0xf]  ;;  %v738_v30 = vld [vmem:[#allocation3 + $0x10] sm:$0xf0]  ;;  %v567_v31 = vor.u32 %v737_v25, %v566_v24  ;;  %v571_v32 = vor.u32 %v736_v26, %v568_v27  ;;  %v768_v35 = vld [vmem:[#allocation8 + $0x28] sm:$0xff] }
  0x1f   :  { %340 = vmatpush.bf16.msra.mxu2 %v760_v8  ;;  %v575_v33 = vor.u32 %v738_v30, %v574_v29  ;;  %v769_v34 = vld [vmem:[#allocation8 + $0x30] sm:$0xff]  ;;  %v767_v36 = vld [vmem:[#allocation8 + $0x20] sm:$0xff]  ;;  %v766_v37 = vld [vmem:[#allocation8 + $0x18] sm:$0xff] }
  0x20   :  { %439 = vmatpush.bf16.msra.mxu3 %v769_v34  ;;  %v765_v38 = vld [vmem:[#allocation8 + $0x10] sm:$0xff]  ;;  %v764_v39 = vld [vmem:[#allocation8 + $0x8] sm:$0xff]  ;;  %v763_v40 = vld [vmem:[#allocation8] sm:$0xff] }
  0x21   :  { %313 = vmatpush.bf16.msra.mxu0 %v743_v9  ;;  %v778_v41 = vld [vmem:[#allocation9 + $0x38] sm:$0xff]  ;;  %v777_v42 = vld [vmem:[#allocation9 + $0x30] sm:$0xff]  ;;  %v776_v45 = vld [vmem:[#allocation9 + $0x28] sm:$0xff] }
  0x22   :  { %327 = vmatpush.bf16.msra.mxu1 %v751_v10  ;;  %v793_v49 = vld [vmem:[%s1023_s2] ss:$0 sm:$0xff]  ;;  %v775_v60 = vld [vmem:[#allocation9 + $0x20] sm:$0xff]  ;;  %v774_v61 = vld [vmem:[#allocation9 + $0x18] sm:$0xff] }
  0x23   :  { %341 = vmatpush.bf16.msra.mxu2 %v759_v12  ;;  %v773_v62 = vld [vmem:[#allocation9 + $0x10] sm:$0xff]  ;;  %v772_v63 = vld [vmem:[#allocation9 + $0x8] sm:$0xff]  ;;  %v771_v0 = vld [vmem:[#allocation9] sm:$0xff] }
  0x24   :  { %440 = vmatpush.bf16.msra.mxu3 %v768_v35  ;;  %v794_v2 = vld [vmem:[%s1025_s4] ss:$0 sm:$0xff]  ;;  %s944_s4 = smov [#allocation11]  }
  0x25   :  { %314 = vmatpush.bf16.msra.mxu0 %v742_v13  ;;  %v795_v10 = vld [vmem:[%s1027_s6] ss:$0 sm:$0xff]  ;;  %s547_s26 = sshll.u32 %s944_s4, 4  ;;  %s548_s26 = int_to_ptr.vmem [resolvable:$true] %s547_s26 }
  0x26   :  { %328 = vmatpush.bf16.msra.mxu1 %v750_v14 }
  0x27   :  { %342 = vmatpush.bf16.msra.mxu2 %v758_v15 }
  0x28   :  { %441 = vmatpush.bf16.msra.mxu3 %v767_v36 }
  0x29   :  { %315 = vmatpush.bf16.msra.mxu0 %v741_v16 }
  0x2a   :  { %329 = vmatpush.bf16.msra.mxu1 %v749_v17 }
  0x2b   :  { %343 = vmatpush.bf16.msra.mxu2 %v757_v18 }
  0x2c   :  { %442 = vmatpush.bf16.msra.mxu3 %v766_v37 }
  0x2d   :  { %316 = vmatpush.bf16.msra.mxu0 %v740_v19 }
  0x2e   :  { %330 = vmatpush.bf16.msra.mxu1 %v748_v20 }
  0x2f   :  { %344 = vmatpush.bf16.msra.mxu2 %v756_v21 }
  0x30   :  { %443 = vmatpush.bf16.msra.mxu3 %v765_v38 }
  0x31   :  { %317 = vmatpush.bf16.msra.mxu0 %v739_v22 }
  0x32   :  { %331 = vmatpush.bf16.msra.mxu1 %v747_v23 }
  0x33   :  { %345 = vmatpush.bf16.msra.mxu2 %v755_v28 }
  0x34   :  { %318 = vmatmul.bf16.vlgmr.msra.gmra.mxu0 %v567_v31  ;;  %444 = vmatpush.bf16.msra.mxu3 %v764_v39 }
  0x35   :  { %332 = vmatmul.bf16.vlgmr.msra.gmra.mxu1 %v571_v32  ;;  %523 = vmatpush.bf16.msrb.mxu0 %v778_v41 }
  0x36   :  { %346 = vmatmul.bf16.vlgmr.msra.gmra.mxu2 %v575_v33 }
  0x38   :  { %445 = vmatpush.bf16.msra.mxu3 %v763_v40 }
  0x39   :  { %524 = vmatpush.bf16.msrb.mxu0 %v777_v42 }
  0x3d   :  { %525 = vmatpush.bf16.msrb.mxu0 %v776_v45 }
  0x41   :  { %526 = vmatpush.bf16.msrb.mxu0 %v775_v60 }
  0x45   :  { %527 = vmatpush.bf16.msrb.mxu0 %v774_v61 }
  0x49   :  { %528 = vmatpush.bf16.msrb.mxu0 %v773_v62 }
  0x4d   :  { %529 = vmatpush.bf16.msrb.mxu0 %v772_v63 }
  0x51   :  { %530 = vmatpush.bf16.msrb.mxu0 %v771_v0 }
  0xb1   :  { %v319_v43 = vpop.f32.mrf.mxu0 }
  0xb2   :  { %v333_v44 = vpop.f32.mrf.mxu1 }
  0xb3   :  { %v334_v46 = vadd.f32 %v333_v44, %v319_v43 }
  0xb9   :  { %v347_v47 = vpop.f32.mrf.mxu2  ;;  %v321_v50 = vpop.f32.mrf.mxu0 }
  0xba   :  { %v348_v48 = vadd.f32 %v347_v47, %v334_v46  ;;  %v335_v51 = vpop.f32.mrf.mxu1 }
  0xbb   :  { %v336_v52 = vadd.f32 %v335_v51, %v321_v50 }
  0xbc   :  { %v365_v53 = vadd.f32 %v793_v49, %v348_v48 }
  0xbe   :  { %796 = vtanh.f32 %v365_v53 }
  0xc1   :  { %v349_v54 = vpop.f32.mrf.mxu2 }
  0xc2   :  { %v350_v55 = vadd.f32 %v349_v54, %v336_v52 }
  0xc4   :  { %v366_v56 = vadd.f32 %v793_v49, %v350_v55  ;;  %v797_v57 = vpop.eup %796 }
  0xc6   :  { %798 = vtanh.f32 %v366_v56 }
  0xcc   :  { %v799_v58 = vpop.eup %798 }
  0xcd   :  { %v369_v59 = vpack.c.bf16 %v799_v58, %v797_v57 }
  0xcf   :  { %446 = vmatmul.bf16.vlgmr.msra.gmra.mxu3 %v369_v59 }
 0x152   :  { %v447_v1 = vpop.f32.mrf.mxu3 }
 0x153   :  { %v448_v3 = vadd.f32 %v794_v2, %v447_v1 }
 0x155   :  { %800 = vtanh.f32 %v448_v3 }
 0x15a   :  { %v449_v4 = vpop.f32.mrf.mxu3 }
 0x15b   :  { %v450_v5 = vadd.f32 %v794_v2, %v449_v4  ;;  %v801_v6 = vpop.eup %800 }
 0x15d   :  { %802 = vtanh.f32 %v450_v5 }
 0x163   :  { %v803_v7 = vpop.eup %802 }
 0x164   :  { %v454_v8 = vpack.c.bf16 %v803_v7, %v801_v6 }
 0x166   :  { %531 = vmatmul.bf16.vlgmr.msrb.gmra.mxu0 %v454_v8 }
 0x1e3   :  { %v532_v9 = vpop.f32.mrf.mxu0 }
 0x1e4   :  { %v533_v11 = vadd.f32 %v795_v10, %v532_v9 }
 0x1e6   :  { %804 = vtanh.f32 %v533_v11 }
 0x1eb   :  { %v534_v12 = vpop.f32.mrf.mxu0 }
 0x1ec   :  { %v535_v13 = vadd.f32 %v795_v10, %v534_v12  ;;  %v805_v14 = vpop.eup %804 }
 0x1ee   :  { %806 = vtanh.f32 %v535_v13 }
 0x1f4   :  { %v807_v15 = vpop.eup %806 }
 0x1f5   :  { %v782_v16 = vpack.c.bf16 %v807_v15, %v805_v14 }
 0x1f7   :  { %783 = vst [vmem:[#allocation11] sm:$0xff] %v782_v16  }
 0x1f8   :  { %555 = dma.vmem_to_hbm [thread:$0]  %s548_s26, 128, %s550_s29, [#allocation5], %s937_s9, %s937_s9, %s938_s10  }
 0x1f9   :  { %934 = dma.done.wait [#allocation5], 128  }
 0x1fa   :  { %935 = vsyncadd [#allocation5], 4294967168 }
 0x1fb   :  { %560 = vsyncpa [#allocation4], 1 }
 0x1fc   :  { %561 = vsyncpa [#allocation7], 1 }
 0x1fd   :  { %562 = vsyncpa [#allocation10], 1 }
 0x1fe   :  { %563 = vsyncpa [#allocation5], 1 }

</bundles_post_ra>
